<compile_context>
chip_gen: v6e
topology: v6e:2x2x1
jax: 0.10.0
libtpu: 0.0.40
codegen_flags: <defaults>
</compile_context>

<pallas_src>
import functools

import jax
import jax.numpy as jnp
from jax.experimental import pallas as pl
from jax.experimental.pallas import tpu as pltpu

_TILE_N = 256                         # output-column (lane) tile
_TILE_K = 256                         # contraction tile
_VMEM_LIMIT_BYTES = 32 * 1024 * 1024  # safe on v5e/v6e (128 MiB) and v7x (64 MiB physical)


def _round_up(x: int, m: int) -> int:
    return ((x + m - 1) // m) * m


# ----------------------------------------------------------------------------
# Pallas kernel: one LGConv layer in transposed layout, tiled over (j, k).
# ----------------------------------------------------------------------------
def _lgconv_kernel(emb_ref, a_ref, accin_ref, embout_ref, accout_ref, acc_scratch,
                   *, scale: float):
    # emb_ref    : (D, tk)  bf16  current-layer embeddings emb^T, contraction slice k
    # a_ref      : (tk, tn) bf16  A^T tile (normalized adjacency, transposed)
    # accin_ref  : (D, tn)  f32   running sum of layer embeddings (input)
    # embout_ref : (D, tn)  bf16  new layer embeddings (feed for the next layer)
    # accout_ref : (D, tn)  f32   updated running sum (scaled on the last layer only)
    # acc_scratch: (D, tn)  f32   VMEM accumulator across contraction tiles
    k = pl.program_id(1)

    @pl.when(k == 0)
    def _():
        acc_scratch[...] = jnp.zeros_like(acc_scratch)

    acc_scratch[...] += jnp.dot(emb_ref[...], a_ref[...],
                                preferred_element_type=jnp.float32)

    @pl.when(k == pl.num_programs(1) - 1)
    def _():
        new_emb = acc_scratch[...]
        embout_ref[...] = new_emb.astype(embout_ref.dtype)
        total = accin_ref[...] + new_emb
        if scale != 1.0:               # (1/(L+1))^2 folded into final writeback only
            total = total * scale
        accout_ref[...] = total.astype(accout_ref.dtype)


def _lgconv_layer(emb_t, a_t, acc_t, *, scale):
    d, n_pad = emb_t.shape
    tn, tk = _TILE_N, _TILE_K
    grid = (n_pad // tn, n_pad // tk)            # reduction axis (k) last
    kernel = functools.partial(_lgconv_kernel, scale=scale)
    emb_out, acc_out = pl.pallas_call(
        kernel,
        out_shape=(
            jax.ShapeDtypeStruct((d, n_pad), jnp.bfloat16),
            jax.ShapeDtypeStruct((d, n_pad), jnp.float32),
        ),
        grid_spec=pltpu.PrefetchScalarGridSpec(
            num_scalar_prefetch=0,
            grid=grid,
            in_specs=[
                pl.BlockSpec((d, tk), lambda j, k: (0, k)),    # emb^T contraction slice
                pl.BlockSpec((tk, tn), lambda j, k: (k, j)),   # A^T tile
                pl.BlockSpec((d, tn), lambda j, k: (0, j)),    # running sum (in)
            ],
            out_specs=(
                pl.BlockSpec((d, tn), lambda j, k: (0, j)),    # new emb^T
                pl.BlockSpec((d, tn), lambda j, k: (0, j)),    # running sum (out)
            ),
            scratch_shapes=[pltpu.VMEM((d, tn), jnp.float32)],
        ),
        compiler_params=pltpu.CompilerParams(
            dimension_semantics=("parallel", "arbitrary"),
            vmem_limit_bytes=_VMEM_LIMIT_BYTES,
        ),
    )(emb_t, a_t, acc_t)
    return emb_out, acc_out


def lightgcn_propagate(a_t_bf16, emb0_pad, num_layers):
    """a_t_bf16: (N_pad, N_pad) bf16 normalized adjacency (transposed).
    emb0_pad : (N_pad, D) f32 initial embeddings (zero-padded rows).
    Returns (N_pad, D) f32 final embeddings (includes the 1/(L+1)*mean double scale)."""
    emb0_t = emb0_pad.T                              # (D, N_pad)
    acc_t = emb0_t.astype(jnp.float32)
    emb_t = emb0_t.astype(jnp.bfloat16)
    scale_sq = (1.0 / float(num_layers + 1)) ** 2
    for layer in range(num_layers):
        scale = scale_sq if layer == num_layers - 1 else 1.0
        emb_t, acc_t = _lgconv_layer(emb_t, a_t_bf16, acc_t, scale=scale)
    if num_layers == 0:
        acc_t = acc_t * scale_sq
    return acc_t.T                                   # (N_pad, D) f32


# ----------------------------------------------------------------------------
# Glue: dense transposed gcn_norm adjacency (no self-loops), zero-padded.
# ----------------------------------------------------------------------------
def build_normalized_adjacency_t(edge_index, num_nodes, n_pad):
    # A_norm[i, j] = deg(i)^-1/2 * deg(j)^-1/2 for each edge j -> i.
    # We build A_norm^T directly (scatter at [src, dst]) so the kernel can compute
    # emb_new^T = emb^T @ A_norm^T without assuming symmetry of the edge list.
    src = edge_index[0]
    dst = edge_index[1]
    ones = jnp.ones(src.shape, jnp.float32)
    deg = jnp.zeros((num_nodes,), jnp.float32).at[dst].add(ones)
    deg_inv_sqrt = jnp.where(deg > 0, jax.lax.rsqrt(jnp.maximum(deg, 1e-12)), 0.0)
    w = deg_inv_sqrt[src] * deg_inv_sqrt[dst]
    # TODO(synk): for production-size graphs (E << N^2) replace this dense O(N^2)
    # materialization with a CSR SpMM Pallas kernel using PrefetchScalarGridSpec.
    a_t = jnp.zeros((n_pad, n_pad), jnp.float32).at[src, dst].add(w)
    return a_t


# ----------------------------------------------------------------------------
# Module wrapper.
# ----------------------------------------------------------------------------
class LightGCN:
    def __init__(self, num_users: int, num_items: int, num_layers: int = 4,
                 dim_h: int = 64, key=None):
        self.num_users = num_users
        self.num_items = num_items
        self.num_layers = num_layers
        self.dim_h = dim_h
        if key is None:
            key = jax.random.PRNGKey(0)
        ku, ki = jax.random.split(key)
        # nn.init.normal_(weight, std=0.01)
        self.emb_users = jax.random.normal(ku, (num_users, dim_h), jnp.float32) * 0.01
        self.emb_items = jax.random.normal(ki, (num_items, dim_h), jnp.float32) * 0.01

    def forward(self, edge_index: jax.Array):
        n = self.num_users + self.num_items
        n_pad = max(_TILE_N, _round_up(n, max(_TILE_N, _TILE_K)))
        emb0 = jnp.concatenate([self.emb_users, self.emb_items], axis=0)
        emb0_pad = jnp.pad(emb0, ((0, n_pad - n), (0, 0)))
        a_t = build_normalized_adjacency_t(edge_index, n, n_pad).astype(jnp.bfloat16)
        emb_final = lightgcn_propagate(a_t, emb0_pad, self.num_layers)[:n]
        emb_users_final = emb_final[: self.num_users]
        emb_items_final = emb_final[self.num_users:]
        return emb_users_final, self.emb_users, emb_items_final, self.emb_items

    __call__ = forward


# ----------------------------------------------------------------------------
# Pure-JAX reference with matching numerics (bf16 operands, f32 accumulation).
# ----------------------------------------------------------------------------
def lightgcn_reference(a_t_f32, emb0, num_layers):
    a_bf = a_t_f32.astype(jnp.bfloat16)
    acc = emb0.T.astype(jnp.float32)
    feed = emb0.T.astype(jnp.bfloat16)
    for _ in range(num_layers):
        new = jnp.dot(feed, a_bf, preferred_element_type=jnp.float32)
        acc = acc + new
        feed = new.astype(jnp.bfloat16)
    scale = 1.0 / float(num_layers + 1)
    return (acc * (scale * scale)).T


if __name__ == "__main__":
    num_users = 192
    num_items = 320
    dim_h = 64
    num_layers = 4
    n = num_users + num_items            # 512 -> n_pad = 512 -> 2x2 tile grid per layer

    key = jax.random.PRNGKey(0)
    model = LightGCN(num_users, num_items, num_layers=num_layers, dim_h=dim_h, key=key)

    # Deterministic synthetic bipartite interaction graph with both edge directions
    # (undirected user-item graph, as LightGCN expects).
    srcs, dsts = [], []
    for u in range(num_users):
        for t in range(5):               # each user interacts with 5 distinct items
            item = (u * 7 + t * 13) % num_items
            item_node = num_users + item
            srcs += [u, item_node]
            dsts += [item_node, u]
    edge_index = jnp.array([srcs, dsts], dtype=jnp.int32)   # (2, E)

    users_final, users_w, items_final, items_w = model(edge_index)
    jax.block_until_ready((users_final, users_w, items_final, items_w))

    # Cross-check the Pallas kernels against the pure-JAX reference.
    n_pad = max(_TILE_N, _round_up(n, max(_TILE_N, _TILE_K)))
    emb0 = jnp.concatenate([model.emb_users, model.emb_items], axis=0)
    emb0_pad = jnp.pad(emb0, ((0, n_pad - n), (0, 0)))
    a_t = build_normalized_adjacency_t(edge_index, n, n_pad)
    ref = lightgcn_reference(a_t, emb0_pad, num_layers)[:n]
    got = jnp.concatenate([users_final, items_final], axis=0)
    assert jnp.allclose(got, ref, atol=1e-6, rtol=1e-4), "kernel mismatch vs reference"

    print("KERNEL_OK")
</pallas_src>

<mosaic_0001>
module attributes {stable_mosaic.version = 11 : i64} {
  func.func @_lgconv_kernel(%arg0: i32, %arg1: i32, %arg2: memref<64x256xbf16, #tpu.memory_space<vmem>>, %arg3: memref<256x256xbf16, #tpu.memory_space<vmem>>, %arg4: memref<64x256xf32, #tpu.memory_space<vmem>>, %arg5: memref<64x256xbf16, #tpu.memory_space<vmem>>, %arg6: memref<64x256xf32, #tpu.memory_space<vmem>>, %arg7: memref<64x256xf32, #tpu.memory_space<vmem>>) attributes {dimension_semantics = [#tpu.dimension_semantics<parallel>, #tpu.dimension_semantics<arbitrary>], iteration_bounds = array<i64: 2, 2>, scalar_prefetch = 0 : i64, scratch_operands = 1 : i64, tpu.core_type = #tpu.core_type<tc>, window_params = [{transform_indices = @transform_0, window_bounds = array<i64: 64, 256>}, {transform_indices = @transform_1, window_bounds = array<i64: 256, 256>}, {transform_indices = @transform_2, window_bounds = array<i64: 64, 256>}, {transform_indices = @transform_3, window_bounds = array<i64: 64, 256>}, {transform_indices = @transform_4, window_bounds = array<i64: 64, 256>}]} {
    %c0_i32 = arith.constant 0 : i32
    %0 = arith.cmpi eq, %arg1, %c0_i32 : i32
    %1 = arith.extui %0 : i1 to i32
    %c0_i32_0 = arith.constant 0 : i32
    %2 = arith.cmpi ne, %1, %c0_i32_0 : i32
    scf.if %2 {
      %cst_9 = arith.constant 0.000000e+00 : f32
      %12 = vector.broadcast %cst_9 : f32 to vector<64x256xf32>
      %c0_10 = arith.constant 0 : index
      %c0_11 = arith.constant 0 : index
      %13 = vector.load %arg7[%c0_10, %c0_11] : memref<64x256xf32, #tpu.memory_space<vmem>>, vector<64x256xf32>
      tpu.vector_store %arg7[%c0_10, %c0_11], %12 {strides = array<i32>} : memref<64x256xf32, #tpu.memory_space<vmem>>, vector<64x256xf32>,
    } else {
    }
    %c0 = arith.constant 0 : index
    %c0_1 = arith.constant 0 : index
    %3 = vector.load %arg7[%c0, %c0_1] : memref<64x256xf32, #tpu.memory_space<vmem>>, vector<64x256xf32>
    %c0_2 = arith.constant 0 : index
    %c0_3 = arith.constant 0 : index
    %4 = vector.load %arg2[%c0_2, %c0_3] : memref<64x256xbf16, #tpu.memory_space<vmem>>, vector<64x256xbf16>
    %c0_4 = arith.constant 0 : index
    %c0_5 = arith.constant 0 : index
    %5 = vector.load %arg3[%c0_4, %c0_5] : memref<256x256xbf16, #tpu.memory_space<vmem>>, vector<256x256xbf16>
    %cst = arith.constant dense<0.000000e+00> : vector<64x256xf32>
    %6 = tpu.matmul %4, %5, %cst {dimension_numbers = #tpu.dot_dimension_numbers<[1], [0], [0], [1], [0, 0, 1, 1], [], []>} : vector<64x256xbf16>, vector<256x256xbf16>, vector<64x256xf32> -> vector<64x256xf32>
    %7 = arith.addf %3, %6 : vector<64x256xf32>
    %c0_6 = arith.constant 0 : index
    %c0_7 = arith.constant 0 : index
    %8 = vector.load %arg7[%c0_6, %c0_7] : memref<64x256xf32, #tpu.memory_space<vmem>>, vector<64x256xf32>
    tpu.vector_store %arg7[%c0_6, %c0_7], %7 {strides = array<i32>} : memref<64x256xf32, #tpu.memory_space<vmem>>, vector<64x256xf32>,
    %c1_i32 = arith.constant 1 : i32
    %9 = arith.cmpi eq, %arg1, %c1_i32 : i32
    %10 = arith.extui %9 : i1 to i32
    %c0_i32_8 = arith.constant 0 : i32
    %11 = arith.cmpi ne, %10, %c0_i32_8 : i32
    scf.if %11 {
      %c0_9 = arith.constant 0 : index
      %c0_10 = arith.constant 0 : index
      %12 = vector.load %arg7[%c0_9, %c0_10] : memref<64x256xf32, #tpu.memory_space<vmem>>, vector<64x256xf32>
      %13 = arith.truncf %12 : vector<64x256xf32> to vector<64x256xbf16>
      %c0_11 = arith.constant 0 : index
      %c0_12 = arith.constant 0 : index
      %14 = vector.load %arg5[%c0_11, %c0_12] : memref<64x256xbf16, #tpu.memory_space<vmem>>, vector<64x256xbf16>
      tpu.vector_store %arg5[%c0_11, %c0_12], %13 {strides = array<i32>} : memref<64x256xbf16, #tpu.memory_space<vmem>>, vector<64x256xbf16>,
      %c0_13 = arith.constant 0 : index
      %c0_14 = arith.constant 0 : index
      %15 = vector.load %arg4[%c0_13, %c0_14] : memref<64x256xf32, #tpu.memory_space<vmem>>, vector<64x256xf32>
      %16 = arith.addf %15, %12 : vector<64x256xf32>
      %c0_15 = arith.constant 0 : index
      %c0_16 = arith.constant 0 : index
      %17 = vector.load %arg6[%c0_15, %c0_16] : memref<64x256xf32, #tpu.memory_space<vmem>>, vector<64x256xf32>
      tpu.vector_store %arg6[%c0_15, %c0_16], %16 {strides = array<i32>} : memref<64x256xf32, #tpu.memory_space<vmem>>, vector<64x256xf32>,
    } else {
    }
    return
  }
  func.func @transform_0(%arg0: i32, %arg1: i32) -> (i32, i32) {
    %c0_i32 = arith.constant 0 : i32
    %c0_i32_0 = arith.constant 0 : i32
    return %c0_i32, %arg1 : i32, i32
  }
  func.func @transform_1(%arg0: i32, %arg1: i32) -> (i32, i32) {
    %c0_i32 = arith.constant 0 : i32
    return %arg1, %arg0 : i32, i32
  }
  func.func @transform_2(%arg0: i32, %arg1: i32) -> (i32, i32) {
    %c0_i32 = arith.constant 0 : i32
    %c0_i32_0 = arith.constant 0 : i32
    return %c0_i32, %arg0 : i32, i32
  }
  func.func @transform_3(%arg0: i32, %arg1: i32) -> (i32, i32) {
    %c0_i32 = arith.constant 0 : i32
    %c0_i32_0 = arith.constant 0 : i32
    return %c0_i32, %arg0 : i32, i32
  }
  func.func @transform_4(%arg0: i32, %arg1: i32) -> (i32, i32) {
    %c0_i32 = arith.constant 0 : i32
    %c0_i32_0 = arith.constant 0 : i32
    return %c0_i32, %arg0 : i32, i32
  }
}

</mosaic_0001>

<bundles_post_ra>
// kernel: tpu_custom_call.1
= control target key start
LH: loop header
LB: loop body
LE: loop exit
PB: predicated region body
PF: predicated region fallthrough
CT: control target
= control target key end

     0   :  { %s2137_s0 = inlined_call_operand.hbm [shape: bf16[64,512], index: 0, kind: input, shape index: {}]   ;;  %s2138_s1 = inlined_call_operand.hbm [shape: bf16[512,512], index: 1, kind: input, shape index: {}]   ;;  %s2139_s2 = inlined_call_operand.hbm [shape: f32[64,512], index: 2, kind: input, shape index: {}]   ;;  %s2140_s3 = inlined_call_operand.hbm [shape: bf16[64,512], index: 3, kind: output, shape index: {0}]   ;;  %s2141_s4 = inlined_call_operand.hbm [shape: f32[64,512], index: 4, kind: output, shape index: {1}]  }
   0x1   :  { %2156 = sst [smem:[#allocation24_spill]] %s2137_s0 }
   0x2   :  { %2157 = sst [smem:[#allocation25_spill]] %s2138_s1 }
   0x3   :  { %2158 = sst [smem:[#allocation26_spill]] %s2139_s2 }
   0x4   :  { %2159 = sst [smem:[#allocation27_spill]] %s2140_s3 }
   0x5   :  { %2160 = sst [smem:[#allocation28_spill]] %s2141_s4 }
   0x6   :  { %10 = vsyncpa [#allocation4], 0 }
   0x7   :  { %12 = vsyncpa [#allocation4 + $0x1], 0 }
   0x8   :  { %13 = vsyncpa [#allocation7], 0 }
   0x9   :  { %15 = vsyncpa [#allocation7 + $0x1], 0 }
   0xa   :  { %16 = vsyncpa [#allocation5], 0 }
   0xb   :  { %18 = vsyncpa [#allocation5 + $0x1], 0 }
   0xc   :  { %19 = vsyncpa [#allocation11], 0 }
   0xd   :  { %21 = vsyncpa [#allocation11 + $0x1], 0  ;;  %s1674_s15 = smov 0   ;;  %s1676_s16 = smov 0  }
   0xe   :  { %s1678_s17 = smov 0   ;;  %s1680_s18 = smov 0  }
   0xf   :  { %s1682_s19 = smov 0   ;;  %s1684_s20 = smov 0  }
  0x10   :  { %s1686_s21 = smov 0   ;;  %s1688_s22 = smov 0  }
  0x11   :  { %s1690_s23 = smov 0   ;;  %s1692_s24 = smov 0  }
  0x12   :  { %s1694_s25 = smov 0   ;;  %s1696_s26 = smov 0  }
  0x13   :  { %s1698_s27 = smov 0   ;;  %s1700_s28 = smov 0  }
  0x14 LB: > { %2161 = sst [smem:[#allocation17_spill]] %s1595_s19  ;;  %s1743_s29 = sadd.s32 4294967295, %s1631_s28   ;;  %s1631_s28 = sphi %s1700_s28, %s27_s28   ;;  %s1627_s27 = sphi %s1698_s27, %s2200_s27   ;;  %s1623_s26 = sphi %s1696_s26, %s2211_s26   ;;  %s1619_s25 = sphi %s1694_s25, %s2198_s25   ;;  %s1615_s24 = sphi %s1692_s24, %s2210_s24   ;;  %s1611_s23 = sphi %s1690_s23, %s2209_s23   ;;  %s1607_s22 = sphi %s1688_s22, %s2208_s22   ;;  %s1603_s21 = sphi %s1686_s21, %s2207_s21   ;;  %s1599_s20 = sphi %s1684_s20, %s2206_s20   ;;  %s1595_s19 = sphi %s1682_s19, %s2205_s19   ;;  %s1591_s18 = sphi %s1680_s18, %s2204_s18   ;;  %s1587_s17 = sphi %s1678_s17, %s2203_s17   ;;  %s1583_s16 = sphi %s1676_s16, %s2202_s16   ;;  %s1579_s15 = sphi %s1674_s15, %s2201_s15  }
  0x15   : > { %2162 = sst [smem:[#allocation18_spill]] %s1615_s24  ;;  %s36_s30 = sadd.s32 1, %s1623_s26 }
  0x16   : > { %2163 = sst [smem:[#allocation19_spill]] %s1619_s25  ;;  %p37_p0 = scmp.ge.s32.totalorder %s36_s30, 2 }
  0x17   : > { %2164 = sst [smem:[#allocation20_spill]] %s1627_s27  ;;  %s39_s5 = sadd.s32 1, %s1627_s27 }
  0x18   : > { %p54_p1 = scmp.eq.s32.totalorder %s1631_s28, 0  ;;  %p2151_p2 = scmp.eq.s32.totalorder %s1743_s29, 0 }
  0x19   : > { %s2213_s30 = smov (%p37_p0, %s36_s30), 0  ;;  %s2215_s5 = smov (!%p37_p0, %s39_s5), %s1627_s27 }
  0x1a   : > { %2165 = sst [smem:[#allocation21_spill]] %s2213_s30  ;;  %s1754_s6 = ssub.s32 %s1623_s26, %s2213_s30 }
  0x1b   : > { %s74_s7 = sadd.s32 1, %s1599_s20  ;;  %p41_p3 = scmp.ge.s32.totalorder %s2215_s5, 2 }
  0x1c   : > { %p44_p4 = scmp.eq.s32.totalorder %s1754_s6, 0  ;;  %p81_p5 = scmp.ne.s32.totalorder %s1599_s20, %s1595_s19 }
  0x1d   : > { %p87_p6 = scmp.ne.s32.totalorder %s1595_s19, %s1591_s18  ;;  %s2217_s5 = smov (%p41_p3, %s2215_s5), 0 }
  0x1e   : > { %2166 = sst [smem:[#allocation22_spill]] %s2217_s5  ;;  %p1765_p7 = por %p81_p5, %p54_p1 }
  0x1f   : > { %p1771_p8 = por %p87_p6, %p2151_p2  ;;  %s1777_s10 = ssub.s32 %s1627_s27, %s2217_s5 }
  0x20   : > { %s71_s11 = sor.u32 %s1777_s10, %s1754_s6  ;;  %p2150_p11 = scmp.lt.s32.totalorder %s1631_s28, 4 }
  0x21   : > { %s2168_s9 = scalar_select %p1771_p8, 1, 0 }
  0x22   : > { %p72_p10 = scmp.eq.s32.totalorder %s71_s11, 0  ;;  %s1108_s12 = sshll.u32 %s1623_s26, 7 }
  0x23   : > { %2169 = sst [smem:[#allocation23_spill]] %s2168_s9  ;;  %s210_s14 = sand.u32 1, %s1631_s28  }
  0x24   : > { %s1785_s13 = scalar_select %p72_p10, %s1599_s20, %s74_s7  }
  0x25   : > { %s212_s18 = sand.u32 1, %s1599_s20   ;;  %s1038_s4 = sshll.u32 %s1627_s27, 1 }
  0x26   : > { %s1036_s30 = sshll.u32 %s212_s18, 8  ;;  %s221_s5 = sadd.s32 %s1108_s12, %s1038_s4 }
  0x27   : > { %s214_s3 = scalar_lea.vmem [#allocation6], %s1036_s30  ;;  %s1040_s24 = sshll.u32 %s221_s5, 6 }
  0x28   : > { %s224_s25 = sshll.u32 %s214_s3, 4  ;;  %s2170_s1 = sld [smem:[#allocation25_spill]]  ;;  %s225_s25 = int_to_ptr.vmem [resolvable:$true] %s224_s25 }
  0x29   : > { %p1799_p12 = pnand %p2150_p11, %p1765_p7  ;;  %p1044_p13 = scmp.ge.s32.totalorder %s1631_s28, 1 }
  0x2a   : > { %p253_p0 = scmp.lt.s32.totalorder %s1631_s28, 5  ;;  %s1805_s7 = scalar_lea.sflag [#allocation7], %s210_s14 }
  0x2b   : > { %p1367_p3 = pneg %p1799_p12  ;;  %s1378_s3 = scalar_lea.vmem %s225_s25, 4096 }
  0x2c   : > { %p1379_p5 = scmp.ne.s32.totalorder %s225_s25, %s1378_s3  ;;  %s1633_s4 = smov [#allocation6]  }
  0x2d   : > { %s1383_s19 = sshll.u32 %s1633_s4, 4  ;;  %s1384_s19 = int_to_ptr.vmem [resolvable:$false] %s1383_s19 }
  0x2e   : > { %s223_s2 = scalar_lea.hbm %s2170_s1, %s1040_s24  ;;  %p1381_p6 = pnand %p1379_p5, %p1367_p3 }
  0x2f   : > { %s1385_s24 = scalar_lea.vmem %s1384_s19, 8192  ;;  %p1386_p9 = scmp.lt.s32.totalorder %s225_s25, %s1384_s19 }
  0x30   : > { %p1382_p10 = pneg %p1381_p6  ;;  %p1387_p7 = scmp.lt.s32.totalorder %s1385_s24, %s1378_s3 }
  0x32   : > { %p1388_p11 = por %p1387_p7, %p1386_p9 }
  0x34   : > { %p1389_p2 = pnand %p1388_p11, %p1382_p10 }
  0x36   : > { %1392 = shalt.err (!%p1389_p2)
}
  0x37   : > { %s2152_s30 = smov 256   ;;  %s1635_s5 = smov 128  }
  0x38   : > { %s1636_s8 = smov 8   ;;  %p1819_p2 = pnand %p1044_p13, %p253_p0 }
  0x39   : > { %1169 = dma.hbm_to_vmem [thread:$0]  (!%p1799_p12), %s223_s2, 4096, %s225_s25, %s1805_s7, %s2152_s30, %s1635_s5, %s1636_s8  }
  0x3a   : > { %s46_s14 = sadd.s32 1, %s1611_s23  ;;  %p53_p9 = scmp.ne.s32.totalorder %s1611_s23, %s1607_s22 }
  0x3b   : > { %s1829_s18 = scalar_select %p44_p4, %s1611_s23, %s46_s14  }
  0x3c   : > { %p55_p11 = por %p54_p1, %p53_p9  ;;  %p59_p3 = scmp.ne.s32.totalorder %s1607_s22, %s1603_s21 }
  0x3d   : > { %s189_s3 = sand.u32 1, %s1611_s23   ;;  %s2173_s0 = sld [smem:[#allocation24_spill]] }
  0x3e   : > { %p2174_p12 = scmp.eq.s32.totalorder %s1743_s29, 0  ;;  %s1033_s19 = sshll.u32 %s189_s3, 6 }
  0x3f   : > { %p2176_p13 = scmp.lt.s32.totalorder %s1631_s28, 4  ;;  %s193_s24 = scalar_lea.vmem [#allocation3], %s1033_s19 }
  0x40   : > { %p1843_p5 = por %p2174_p12, %p59_p3  ;;  %s200_s21 = sshll.u32 %s193_s24, 4  ;;  %s201_s21 = int_to_ptr.vmem [resolvable:$true] %s200_s21 }
  0x41   : > { %p1849_p0 = pnand %p2176_p13, %p55_p11  ;;  %s190_s14 = scalar_lea.sflag [#allocation4], %s189_s3 }
  0x42   : > { %s1406_s11 = scalar_lea.vmem %s201_s21, 1024 }
  0x43   : > { %s199_s2 = scalar_lea.hbm %s2173_s0, %s1108_s12  ;;  %p1395_p4 = pneg %p1849_p0 }
  0x44   : > { %p1407_p6 = scmp.ne.s32.totalorder %s201_s21, %s1406_s11  ;;  %s1637_s12 = smov [#allocation3]  }
  0x45   : > { %s1411_s4 = sshll.u32 %s1637_s12, 4  ;;  %s1412_s4 = int_to_ptr.vmem [resolvable:$false] %s1411_s4 }
  0x46   : > { %p1409_p10 = pnand %p1407_p6, %p1395_p4  ;;  %s1413_s30 = scalar_lea.vmem %s1412_s4, 2048 }
  0x47   : > { %p1414_p9 = scmp.lt.s32.totalorder %s201_s21, %s1412_s4  ;;  %p1415_p11 = scmp.lt.s32.totalorder %s1413_s30, %s1406_s11 }
  0x48   : > { %p1410_p7 = pneg %p1409_p10 }
  0x49   : > { %p1416_p3 = por %p1415_p11, %p1414_p9 }
  0x4b   : > { %p1417_p12 = pnand %p1416_p3, %p1410_p7 }
  0x4d   : > { %1420 = shalt.err (!%p1417_p12)
}
  0x4e   : > { %s2178_s3 = smov 256   ;;  %s1030_s30 = sadd.s32 4294967294, %s1631_s28  }
  0x4f   : > { %1166 = dma.hbm_to_vmem [thread:$0]  (!%p1849_p0), %s199_s2, 1024, %s201_s21, %s190_s14, %s2178_s3, %s1635_s5, %s1636_s8  }
  0x50   : > { %s100_s19 = sadd.s32 1, %s1587_s17  ;;  %p2179_p13 = scmp.eq.s32.totalorder %s1777_s10, 0 }
  0x51   : > { %p107_p4 = scmp.ne.s32.totalorder %s1587_s17, %s1583_s16  ;;  %p113_p6 = scmp.ne.s32.totalorder %s1583_s16, %s1579_s15 }
  0x52   : > { %s1865_s6 = scalar_select %p2179_p13, %s1587_s17, %s100_s19  }
  0x53   : > { %p137_p10 = scmp.eq.s32.totalorder %s1743_s29, 3  ;;  %p143_p7 = scmp.eq.s32.totalorder %s1030_s30, 3 }
  0x54   : > { %p109_p9 = por %p107_p4, %p54_p1  ;;  %p2180_p11 = scmp.eq.s32.totalorder %s1743_s29, 0 }
  0x55   : > { %p1880_p12 = por %p137_p10, %p107_p4  ;;  %p1884_p0 = por %p143_p7, %p113_p6 }
  0x56   : > { %p1876_p3 = por %p113_p6, %p2180_p11  ;;  %s236_s10 = sand.u32 1, %s1587_s17  }
  0x57   : > { %s2183_s5 = scalar_select %p1884_p0, 1, 0 }
  0x58   : > { %s1110_s8 = sshll.u32 %s1627_s27, 8  ;;  %s1041_s2 = sshll.u32 %s236_s10, 7 }
  0x59   : > { %s2184_s12 = sld [smem:[#allocation26_spill]]  ;;  %p2185_p1 = scmp.lt.s32.totalorder %s1631_s28, 4 }
  0x5a   : > { %s238_s19 = scalar_lea.vmem [#allocation8], %s1041_s2  ;;  %s1638_s10 = smov [#allocation8]  }
  0x5b   : > { %p1895_p13 = pnand %p2185_p1, %p109_p9  ;;  %s245_s0 = sshll.u32 %s238_s19, 4  ;;  %s246_s0 = int_to_ptr.vmem [resolvable:$true] %s245_s0 }
  0x5c   : > { %s1434_s1 = scalar_lea.vmem %s246_s0, 2048  ;;  %s1439_s27 = sshll.u32 %s1638_s10, 4  ;;  %s1440_s27 = int_to_ptr.vmem [resolvable:$false] %s1439_s27 }
  0x5d   : > { %p1423_p4 = pneg %p1895_p13  ;;  %p1435_p6 = scmp.ne.s32.totalorder %s246_s0, %s1434_s1 }
  0x5e   : > { %s1441_s21 = scalar_lea.vmem %s1440_s27, 4096  ;;  %p1442_p11 = scmp.lt.s32.totalorder %s246_s0, %s1440_s27 }
  0x5f   : > { %s244_s4 = scalar_lea.hbm %s2184_s12, %s1110_s8  ;;  %p1437_p10 = pnand %p1435_p6, %p1423_p4 }
  0x60   : > { %p1443_p0 = scmp.lt.s32.totalorder %s1441_s21, %s1434_s1 }
  0x61   : > { %p1438_p7 = pneg %p1437_p10 }
  0x62   : > { %p1444_p9 = por %p1443_p0, %p1442_p11 }
  0x64   : > { %p1445_p1 = pnand %p1444_p9, %p1438_p7 }
  0x66   : > { %1448 = shalt.err (!%p1445_p1)
}
  0x67   : > { %s1639_s8 = smov 512   ;;  %s1640_s2 = smov 16  }
  0x68   : > { %1172 = dma.hbm_to_vmem [thread:$0]  (!%p1895_p13), %s244_s4, 2048, %s246_s0, %s1805_s7, %s1639_s8, %s2178_s3, %s1640_s2  }
  0x69   : > { %257 = sbr.rel (%p1819_p2) target bundleno = 490 (0x1ea), region = 32  ;;  %s259_s14 = sand.u32 (!%p1819_p2), 1, %s1607_s22  }
  0x6a   : > { %s1045_s12 = sshll.u32 (!%p1819_p2), %s259_s14, 6  ;;  %s260_s19 = scalar_lea.sflag (!%p1819_p2), [#allocation4], %s259_s14 }
  0x6b   : > { %s1908_s27 = scalar_lea.vmem (!%p1819_p2), [#allocation3], %s1045_s12 }
  0x6e   : > { %1558 = dma.done.wait (%p1843_p5), %s260_s19, 1024  }
  0x6f   : > { %1560 = vsyncadd (%p1843_p5), %s260_s19, 4294966272  ;;  %s2187_s1 = sld [smem:[#allocation17_spill]]  ;;  %s268_s10 = sand.u32 1, %s1743_s29  }
  0x70   : > { %s269_s9 = scalar_lea.sflag [#allocation7], %s268_s10 }
  0x75   : > { %s270_s0 = sand.u32 1, %s2187_s1  }
  0x76   : > { %s1046_s7 = sshll.u32 %s270_s0, 8 }
  0x77   : > { %s1916_s3 = scalar_lea.vmem [#allocation6], %s1046_s7 }
  0x78   : > { %1562 = dma.done.wait (%p1771_p8), %s269_s9, 4096  }
  0x79   : > { %1564 = vsyncadd (%p1771_p8), %s269_s9, 4294963200  ;;  %s1923_s4 = sand.u32 1, %s1583_s16  }
  0x7a   : > { %s1047_s25 = sshll.u32 %s1923_s4, 7 }
  0x7b   : > { %s1926_s21 = scalar_lea.vmem [#allocation8], %s1047_s25 }
  0x7c   : > { %1566 = dma.done.wait (%p1876_p3), %s269_s9, 2048  }
  0x7d   : > { %1568 = vsyncadd (%p1876_p3), %s269_s9, 4294965248  ;;  %s1048_s29 = sshll.u32 %s1923_s4, 6  ;;  %s1935_s2 = scalar_lea.vmem [#allocation10], %s1047_s25 }
  0x7e   : > { %s1933_s8 = scalar_lea.vmem [#allocation9], %s1048_s29  ;;  %s2189_s14 = sld [smem:[#allocation18_spill]] }
  0x84   : > { %p1050_p8 = scmp.ne.s32.totalorder %s2189_s14, 0 }
  0x86   : > { %330 = sbr.rel (%p1050_p8) target bundleno = 148 (0x94), region = 48 }
  0x8b   : > { %v1641_v0 = vmov 0.0  }
  0x8c   : > { %331 = vst [vmem:[#allocation2 + $0x30] sm:$0xff] %v1641_v0  ;;  %332 = vst [vmem:[#allocation2] sm:$0xff] %v1641_v0 }
  0x8d   : > { %333 = vst [vmem:[#allocation2 + $0x58] sm:$0xff] %v1641_v0  ;;  %334 = vst [vmem:[#allocation2 + $0x18] sm:$0xff] %v1641_v0 }
  0x8e   : > { %335 = vst [vmem:[#allocation2 + $0x50] sm:$0xff] %v1641_v0  ;;  %336 = vst [vmem:[#allocation2 + $0x68] sm:$0xff] %v1641_v0 }
  0x8f   : > { %337 = vst [vmem:[#allocation2 + $0x8] sm:$0xff] %v1641_v0  ;;  %338 = vst [vmem:[#allocation2 + $0x48] sm:$0xff] %v1641_v0 }
  0x90   : > { %339 = vst [vmem:[#allocation2 + $0x40] sm:$0xff] %v1641_v0  ;;  %340 = vst [vmem:[#allocation2 + $0x20] sm:$0xff] %v1641_v0 }
  0x91   : > { %341 = vst [vmem:[#allocation2 + $0x10] sm:$0xff] %v1641_v0  ;;  %342 = vst [vmem:[#allocation2 + $0x38] sm:$0xff] %v1641_v0 }
  0x92   : > { %343 = vst [vmem:[#allocation2 + $0x60] sm:$0xff] %v1641_v0  ;;  %344 = vst [vmem:[#allocation2 + $0x70] sm:$0xff] %v1641_v0 }
  0x93   : > { %345 = vst [vmem:[#allocation2 + $0x78] sm:$0xff] %v1641_v0  ;;  %346 = vst [vmem:[#allocation2 + $0x28] sm:$0xff] %v1641_v0 }
  0x94 PF: > { %v1305_v1 = vld [vmem:[%s1916_s3 + $0x74] ss:$8 sps:$4 sm:$0xff]   ;;  %v1307_v2 = vld [vmem:[%s1916_s3 + $0x70] ss:$8 sps:$4 sm:$0xff]   ;;  %v1308_v3 = vld [vmem:[%s1916_s3 + $0x64] ss:$8 sps:$4 sm:$0xff]  }
  0x95   : > { %603 = vmatprep.subr.bf16.mxu0 %v1305_v1  ;;  %1121 = vmatprep.subr.bf16.mxu1 %v1305_v1  ;;  %v1310_v4 = vld [vmem:[%s1916_s3 + $0x60] ss:$8 sps:$4 sm:$0xff]   ;;  %v1311_v5 = vld [vmem:[%s1916_s3 + $0x54] ss:$8 sps:$4 sm:$0xff]   ;;  %v1313_v6 = vld [vmem:[%s1916_s3 + $0x50] ss:$8 sps:$4 sm:$0xff]  }
  0x96   : > { %604 = vmatpush1.bf16.msra.mxu0 %v1307_v2  ;;  %1137 = vmatpush1.bf16.msra.mxu1 %v1307_v2  ;;  %v1314_v7 = vld [vmem:[%s1916_s3 + $0x44] ss:$8 sps:$4 sm:$0xff]   ;;  %v1316_v8 = vld [vmem:[%s1916_s3 + $0x40] ss:$8 sps:$4 sm:$0xff]   ;;  %v1317_v9 = vld [vmem:[%s1916_s3 + $0x34] ss:$8 sps:$4 sm:$0xff]  }
  0x97   : > { %605 = vmatprep.subr.bf16.mxu0 %v1308_v3  ;;  %1122 = vmatprep.subr.bf16.mxu1 %v1308_v3  ;;  %v1319_v10 = vld [vmem:[%s1916_s3 + $0x30] ss:$8 sps:$4 sm:$0xff]   ;;  %v1320_v11 = vld [vmem:[%s1916_s3 + $0x24] ss:$8 sps:$4 sm:$0xff]   ;;  %v1322_v12 = vld [vmem:[%s1916_s3 + $0x20] ss:$8 sps:$4 sm:$0xff]  }
  0x98   : > { %v1323_v13 = vld [vmem:[%s1916_s3 + $0x14] ss:$8 sps:$4 sm:$0xff]   ;;  %v1355_v14 = vld [vmem:[%s1908_s27 + $0x4] ss:$8 sps:$4 sm:$0xff]   ;;  %v1325_v15 = vld [vmem:[%s1916_s3 + $0x10] ss:$8 sps:$4 sm:$0xff]  }
  0x99   : > { %v1358_v16 = vld [vmem:[%s1908_s27 + $0x24] ss:$8 sps:$4 sm:$0xff]   ;;  %635 = vmatprep.mubr.bf16.mxu0 %v1355_v14  ;;  %v1328_v18 = vld [vmem:[%s1916_s3] ss:$8 sps:$4 sm:$0xff]   ;;  %v1329_v19 = vld [vmem:[%s1916_s3 + $0xf4] ss:$8 sps:$4 sm:$0xff]  }
  0x9a   : > { %606 = vmatpush1.bf16.msra.mxu0 %v1310_v4  ;;  %1138 = vmatpush1.bf16.msra.mxu1 %v1310_v4  ;;  %v1326_v17 = vld [vmem:[%s1916_s3 + $0x4] ss:$8 sps:$4 sm:$0xff]   ;;  %v1331_v20 = vld [vmem:[%s1916_s3 + $0xf0] ss:$8 sps:$4 sm:$0xff]   ;;  %v1334_v22 = vld [vmem:[%s1916_s3 + $0xe0] ss:$8 sps:$4 sm:$0xff]  }
  0x9b   : > { %607 = vmatprep.subr.bf16.mxu0 %v1311_v5  ;;  %1123 = vmatprep.subr.bf16.mxu1 %v1311_v5  ;;  %v1332_v21 = vld [vmem:[%s1916_s3 + $0xe4] ss:$8 sps:$4 sm:$0xff]   ;;  %v1335_v23 = vld [vmem:[%s1916_s3 + $0xd4] ss:$8 sps:$4 sm:$0xff]   ;;  %v1337_v24 = vld [vmem:[%s1916_s3 + $0xd0] ss:$8 sps:$4 sm:$0xff]  }
  0x9c   : > { %655 = vmatprep.mubr.bf16.mxu1 %v1358_v16  ;;  %v1338_v25 = vld [vmem:[%s1916_s3 + $0xc4] ss:$8 sps:$4 sm:$0xff]   ;;  %v1340_v26 = vld [vmem:[%s1916_s3 + $0xc0] ss:$8 sps:$4 sm:$0xff]   ;;  %v1341_v27 = vld [vmem:[%s1916_s3 + $0xb4] ss:$8 sps:$4 sm:$0xff]  }
  0x9d   : > { %v1343_v28 = vld [vmem:[%s1916_s3 + $0xb0] ss:$8 sps:$4 sm:$0xff]   ;;  %v1344_v29 = vld [vmem:[%s1916_s3 + $0xa4] ss:$8 sps:$4 sm:$0xff]   ;;  %v1346_v30 = vld [vmem:[%s1916_s3 + $0xa0] ss:$8 sps:$4 sm:$0xff]  }
  0x9e   : > { %608 = vmatpush1.bf16.msra.mxu0 %v1313_v6  ;;  %1139 = vmatpush1.bf16.msra.mxu1 %v1313_v6  ;;  %v1347_v31 = vld [vmem:[%s1916_s3 + $0x94] ss:$8 sps:$4 sm:$0xff]   ;;  %v1349_v32 = vld [vmem:[%s1916_s3 + $0x90] ss:$8 sps:$4 sm:$0xff]   ;;  %v1350_v33 = vld [vmem:[%s1916_s3 + $0x84] ss:$8 sps:$4 sm:$0xff]  }
  0x9f   : > { %609 = vmatprep.subr.bf16.mxu0 %v1314_v7  ;;  %1124 = vmatprep.subr.bf16.mxu1 %v1314_v7  ;;  %v1352_v34 = vld [vmem:[%s1916_s3 + $0x80] ss:$8 sps:$4 sm:$0xff]   ;;  %v1359_v37 = vld [vmem:[%s1908_s27 + $0x14] ss:$8 sps:$4 sm:$0xff]   ;;  %v1363_v39 = vld [vmem:[%s1908_s27 + $0x10] ss:$8 sps:$4 sm:$0xff]  }
  0xa0   : > { %v1353_v35 = vld [vmem:[%s1908_s27] ss:$8 sps:$4 sm:$0xff]   ;;  %v1361_v38 = vld [vmem:[%s1908_s27 + $0x34] ss:$8 sps:$4 sm:$0xff]   ;;  %v1364_v40 = vld [vmem:[%s1908_s27 + $0x30] ss:$8 sps:$4 sm:$0xff]  }
  0xa1   : > { %v1356_v36 = vld [vmem:[%s1908_s27 + $0x20] ss:$8 sps:$4 sm:$0xff]   ;;  %v347_v41 = vld [vmem:[#allocation2 + $0x30] sm:$0xff]  ;;  %v349_v51 = vld [vmem:[#allocation2 + $0x58] sm:$0xff]  ;;  %s2190_s24 = sld [smem:[#allocation18_spill]] }
  0xa2   : > { %610 = vmatpush1.bf16.msra.mxu0 %v1316_v8  ;;  %1140 = vmatpush1.bf16.msra.mxu1 %v1316_v8  ;;  %v355_v42 = vld [vmem:[#allocation2 + $0x40] sm:$0xff]  ;;  %v357_v52 = vld [vmem:[#allocation2 + $0x10] sm:$0xff]  ;;  %v350_v57 = vld [vmem:[#allocation2 + $0x18] sm:$0xff] }
  0xa3   : > { %611 = vmatprep.subr.bf16.mxu0 %v1317_v9  ;;  %1125 = vmatprep.subr.bf16.mxu1 %v1317_v9  ;;  %v348_v45 = vld [vmem:[#allocation2] sm:$0xff]  ;;  %v358_v58 = vld [vmem:[#allocation2 + $0x38] sm:$0xff]  ;;  %v351_v63 = vld [vmem:[#allocation2 + $0x50] sm:$0xff] }
  0xa4   : > { %v356_v46 = vld [vmem:[#allocation2 + $0x20] sm:$0xff]  ;;  %v352_v5 = vld [vmem:[#allocation2 + $0x68] sm:$0xff]  ;;  %v360_v6 = vld [vmem:[#allocation2 + $0x70] sm:$0xff] }
  0xa5   : > { %v359_v0 = vld [vmem:[#allocation2 + $0x60] sm:$0xff] }
  0xa6   : > { %612 = vmatpush1.bf16.msra.mxu0 %v1319_v10  ;;  %1141 = vmatpush1.bf16.msra.mxu1 %v1319_v10 }
  0xa7   : > { %613 = vmatprep.subr.bf16.mxu0 %v1320_v11  ;;  %1126 = vmatprep.subr.bf16.mxu1 %v1320_v11  ;;  %v353_v11 = vld [vmem:[#allocation2 + $0x8] sm:$0xff]  ;;  %p1091_p2 = scmp.ne.s32.totalorder %s2190_s24, 1 }
  0xaa   : > { %614 = vmatpush1.bf16.msra.mxu0 %v1322_v12  ;;  %1142 = vmatpush1.bf16.msra.mxu1 %v1322_v12  ;;  %v361_v12 = vld [vmem:[#allocation2 + $0x78] sm:$0xff] }
  0xab   : > { %615 = vmatprep.subr.bf16.mxu0 %v1323_v13  ;;  %1127 = vmatprep.subr.bf16.mxu1 %v1323_v13 }
  0xae   : > { %616 = vmatpush1.bf16.msra.mxu0 %v1325_v15  ;;  %1143 = vmatpush1.bf16.msra.mxu1 %v1325_v15 }
  0xaf   : > { %617 = vmatprep.subr.bf16.mxu0 %v1326_v17  ;;  %1128 = vmatprep.subr.bf16.mxu1 %v1326_v17  ;;  %v354_v17 = vld [vmem:[#allocation2 + $0x48] sm:$0xff] }
  0xb2   : > { %618 = vmatpush1.bf16.msra.mxu0 %v1328_v18  ;;  %1144 = vmatpush1.bf16.msra.mxu1 %v1328_v18  ;;  %v362_v18 = vld [vmem:[#allocation2 + $0x28] sm:$0xff] }
  0xb3   : > { %619 = vmatprep.subr.bf16.mxu0 %v1329_v19  ;;  %1129 = vmatprep.subr.bf16.mxu1 %v1329_v19 }
  0xb6   : > { %620 = vmatpush2.bf16.msra.mxu0 %v1331_v20  ;;  %1145 = vmatpush2.bf16.msra.mxu1 %v1331_v20 }
  0xb7   : > { %621 = vmatprep.subr.bf16.mxu0 %v1332_v21  ;;  %1130 = vmatprep.subr.bf16.mxu1 %v1332_v21 }
  0xba   : > { %622 = vmatpush2.bf16.msra.mxu0 %v1334_v22  ;;  %1146 = vmatpush2.bf16.msra.mxu1 %v1334_v22 }
  0xbb   : > { %623 = vmatprep.subr.bf16.mxu0 %v1335_v23  ;;  %1131 = vmatprep.subr.bf16.mxu1 %v1335_v23 }
  0xbe   : > { %624 = vmatpush2.bf16.msra.mxu0 %v1337_v24  ;;  %1147 = vmatpush2.bf16.msra.mxu1 %v1337_v24 }
  0xbf   : > { %625 = vmatprep.subr.bf16.mxu0 %v1338_v25  ;;  %1132 = vmatprep.subr.bf16.mxu1 %v1338_v25 }
  0xc2   : > { %626 = vmatpush2.bf16.msra.mxu0 %v1340_v26  ;;  %1148 = vmatpush2.bf16.msra.mxu1 %v1340_v26 }
  0xc3   : > { %627 = vmatprep.subr.bf16.mxu0 %v1341_v27  ;;  %1133 = vmatprep.subr.bf16.mxu1 %v1341_v27 }
  0xc6   : > { %628 = vmatpush2.bf16.msra.mxu0 %v1343_v28  ;;  %1149 = vmatpush2.bf16.msra.mxu1 %v1343_v28 }
  0xc7   : > { %629 = vmatprep.subr.bf16.mxu0 %v1344_v29  ;;  %1134 = vmatprep.subr.bf16.mxu1 %v1344_v29 }
  0xca   : > { %630 = vmatpush2.bf16.msra.mxu0 %v1346_v30  ;;  %1150 = vmatpush2.bf16.msra.mxu1 %v1346_v30 }
  0xcb   : > { %631 = vmatprep.subr.bf16.mxu0 %v1347_v31  ;;  %1135 = vmatprep.subr.bf16.mxu1 %v1347_v31 }
  0xce   : > { %632 = vmatpush2.bf16.msra.mxu0 %v1349_v32  ;;  %1151 = vmatpush2.bf16.msra.mxu1 %v1349_v32 }
  0xcf   : > { %633 = vmatprep.subr.bf16.mxu0 %v1350_v33  ;;  %1136 = vmatprep.subr.bf16.mxu1 %v1350_v33 }
  0xd2   : > { %634 = vmatpush2.bf16.msra.mxu0 %v1352_v34  ;;  %1152 = vmatpush2.bf16.msra.mxu1 %v1352_v34 }
  0xd5   : > { %636 = vmatmul.mubr.bf16.vlgmr.msra.gmra.mxu0 %v1353_v35  ;;  %656 = vmatmul.mubr.bf16.vlgmr.msra.gmra.mxu1 %v1356_v36 }
  0xd6   : > { %645 = vmatprep.mubr.bf16.mxu0 %v1359_v37  ;;  %665 = vmatprep.mubr.bf16.mxu1 %v1361_v38 }
  0xdd   : > { %646 = vmatmul.mubr.bf16.gmra.mxu0 %v1363_v39  ;;  %666 = vmatmul.mubr.bf16.gmra.mxu1 %v1364_v40 }
 0x195   : > { %v637_v43 = vpop.f32.mrf.mxu0  ;;  %v657_v44 = vpop.f32.mrf.mxu1 }
 0x196   : > { %v676_v47 = vadd.f32 %v637_v43, %v347_v41  ;;  %v684_v48 = vadd.f32 %v657_v44, %v355_v42 }
 0x197   : > { %v639_v49 = vpop.f32.mrf.mxu0  ;;  %v659_v50 = vpop.f32.mrf.mxu1 }
 0x198   : > { %692 = vst [vmem:[#allocation2 + $0x30] sm:$0xff] %v676_v47  ;;  %700 = vst [vmem:[#allocation2 + $0x40] sm:$0xff] %v684_v48  ;;  %v677_v53 = vadd.f32 %v639_v49, %v348_v45  ;;  %v685_v54 = vadd.f32 %v659_v50, %v356_v46 }
 0x199   : > { %v641_v55 = vpop.f32.mrf.mxu0  ;;  %v661_v56 = vpop.f32.mrf.mxu1 }
 0x19a   : > { %693 = vst [vmem:[#allocation2] sm:$0xff] %v677_v53  ;;  %701 = vst [vmem:[#allocation2 + $0x20] sm:$0xff] %v685_v54  ;;  %v678_v59 = vadd.f32 %v641_v55, %v349_v51  ;;  %v686_v60 = vadd.f32 %v661_v56, %v357_v52 }
 0x19b   : > { %v643_v61 = vpop.f32.mrf.mxu0  ;;  %v663_v62 = vpop.f32.mrf.mxu1 }
 0x19c   : > { %694 = vst [vmem:[#allocation2 + $0x58] sm:$0xff] %v678_v59  ;;  %702 = vst [vmem:[#allocation2 + $0x10] sm:$0xff] %v686_v60  ;;  %v679_v1 = vadd.f32 %v643_v61, %v350_v57  ;;  %v687_v2 = vadd.f32 %v663_v62, %v358_v58 }
 0x19d   : > { %v647_v3 = vpop.f32.mrf.mxu0  ;;  %v667_v4 = vpop.f32.mrf.mxu1 }
 0x19e   : > { %695 = vst [vmem:[#allocation2 + $0x18] sm:$0xff] %v679_v1  ;;  %703 = vst [vmem:[#allocation2 + $0x38] sm:$0xff] %v687_v2  ;;  %v680_v7 = vadd.f32 %v647_v3, %v351_v63  ;;  %v688_v8 = vadd.f32 %v667_v4, %v359_v0 }
 0x19f   : > { %v649_v9 = vpop.f32.mrf.mxu0  ;;  %v669_v10 = vpop.f32.mrf.mxu1 }
 0x1a0   : > { %696 = vst [vmem:[#allocation2 + $0x50] sm:$0xff] %v680_v7  ;;  %704 = vst [vmem:[#allocation2 + $0x60] sm:$0xff] %v688_v8  ;;  %v681_v13 = vadd.f32 %v649_v9, %v352_v5  ;;  %v689_v14 = vadd.f32 %v669_v10, %v360_v6 }
 0x1a1   : > { %v651_v15 = vpop.f32.mrf.mxu0  ;;  %v671_v16 = vpop.f32.mrf.mxu1 }
 0x1a2   : > { %697 = vst [vmem:[#allocation2 + $0x68] sm:$0xff] %v681_v13  ;;  %705 = vst [vmem:[#allocation2 + $0x70] sm:$0xff] %v689_v14  ;;  %v682_v19 = vadd.f32 %v651_v15, %v353_v11  ;;  %v690_v20 = vadd.f32 %v671_v16, %v361_v12  ;;  %711 = sbr.rel (%p1091_p2) target bundleno = 440 (0x1b8), region = 52 }
 0x1a3   : > { %v653_v21 = vpop.f32.mrf.mxu0  ;;  %v673_v22 = vpop.f32.mrf.mxu1 }
 0x1a4   : > { %698 = vst [vmem:[#allocation2 + $0x8] sm:$0xff] %v682_v19  ;;  %706 = vst [vmem:[#allocation2 + $0x78] sm:$0xff] %v690_v20  ;;  %v683_v23 = vadd.f32 %v653_v21, %v354_v17  ;;  %v691_v24 = vadd.f32 %v673_v22, %v362_v18 }
 0x1a6   : > { %699 = vst [vmem:[#allocation2 + $0x48] sm:$0xff] %v683_v23  ;;  %707 = vst [vmem:[#allocation2 + $0x28] sm:$0xff] %v691_v24 }
 0x1a7   : > { %v712_v25 = vld [vmem:[#allocation2 + $0x30] sm:$0xff]  ;;  %v713_v26 = vld [vmem:[#allocation2] sm:$0xff]  ;;  %v714_v27 = vld [vmem:[#allocation2 + $0x58] sm:$0xff] }
 0x1a8   : > { %v1111_v28 = vpack.c.bf16 %v713_v26, %v712_v25  ;;  %v715_v29 = vld [vmem:[#allocation2 + $0x18] sm:$0xff]  ;;  %v716_v30 = vld [vmem:[#allocation2 + $0x50] sm:$0xff]  ;;  %v720_v36 = vld [vmem:[#allocation2 + $0x40] sm:$0xff] }
 0x1a9   : > { %v717_v31 = vld [vmem:[#allocation2 + $0x68] sm:$0xff]  ;;  %v1112_v32 = vpack.c.bf16 %v715_v29, %v714_v27  ;;  %v721_v38 = vld [vmem:[#allocation2 + $0x20] sm:$0xff]  ;;  %v722_v39 = vld [vmem:[#allocation2 + $0x10] sm:$0xff] }
 0x1aa   : > { %v1113_v33 = vpack.c.bf16 %v717_v31, %v716_v30  ;;  %776 = vst [vmem:[%s1933_s8] sm:$0xff] %v1111_v28  ;;  %v723_v40 = vld [vmem:[#allocation2 + $0x38] sm:$0xff]  ;;  %v1115_v41 = vpack.c.bf16 %v721_v38, %v720_v36  ;;  %v724_v43 = vld [vmem:[#allocation2 + $0x60] sm:$0xff]  ;;  %v725_v44 = vld [vmem:[#allocation2 + $0x70] sm:$0xff] }
 0x1ab   : > { %v718_v34 = vld [vmem:[#allocation2 + $0x8] sm:$0xff]  ;;  %777 = vst [vmem:[%s1933_s8 + $0x8] sm:$0xff] %v1112_v32  ;;  %v1116_v42 = vpack.c.bf16 %v723_v40, %v722_v39  ;;  %v726_v45 = vld [vmem:[#allocation2 + $0x78] sm:$0xff]  ;;  %v1117_v46 = vpack.c.bf16 %v725_v44, %v724_v43  ;;  %v784_v48 = vld [vmem:[%s1926_s21] sm:$0xff] }
 0x1ac   : > { %778 = vst [vmem:[%s1933_s8 + $0x10] sm:$0xff] %v1113_v33  ;;  %v785_v49 = vld [vmem:[%s1926_s21 + $0x8] sm:$0xff]  ;;  %780 = vst [vmem:[%s1933_s8 + $0x20] sm:$0xff] %v1115_v41  ;;  %v800_v51 = vadd.f32 %v784_v48, %v712_v25  ;;  %v786_v53 = vld [vmem:[%s1926_s21 + $0x10] sm:$0xff] }
 0x1ad   : > { %v719_v35 = vld [vmem:[#allocation2 + $0x48] sm:$0xff]  ;;  %781 = vst [vmem:[%s1933_s8 + $0x28] sm:$0xff] %v1116_v42  ;;  %v801_v52 = vadd.f32 %v785_v49, %v713_v26  ;;  %v787_v54 = vld [vmem:[%s1926_s21 + $0x18] sm:$0xff]  ;;  %v788_v55 = vld [vmem:[%s1926_s21 + $0x20] sm:$0xff]  ;;  %v802_v56 = vadd.f32 %v786_v53, %v714_v27 }
 0x1ae   : > { %v1114_v37 = vpack.c.bf16 %v719_v35, %v718_v34  ;;  %v727_v47 = vld [vmem:[#allocation2 + $0x28] sm:$0xff]  ;;  %782 = vst [vmem:[%s1933_s8 + $0x30] sm:$0xff] %v1117_v46  ;;  %v803_v57 = vadd.f32 %v787_v54, %v715_v29  ;;  %v804_v58 = vadd.f32 %v788_v55, %v716_v30  ;;  %v790_v60 = vld [vmem:[%s1926_s21 + $0x30] sm:$0xff]  ;;  %v791_v61 = vld [vmem:[%s1926_s21 + $0x38] sm:$0xff] }
 0x1af   : > { %v1118_v50 = vpack.c.bf16 %v727_v47, %v726_v45  ;;  %v789_v59 = vld [vmem:[%s1926_s21 + $0x28] sm:$0xff]  ;;  %816 = vst [vmem:[%s1935_s2] sm:$0xff] %v800_v51  ;;  %817 = vst [vmem:[%s1935_s2 + $0x8] sm:$0xff] %v801_v52  ;;  %v806_v63 = vadd.f32 %v790_v60, %v718_v34  ;;  %v807_v0 = vadd.f32 %v791_v61, %v719_v35  ;;  %v792_v1 = vld [vmem:[%s1926_s21 + $0x40] sm:$0xff] }
 0x1b0   : > { %779 = vst [vmem:[%s1933_s8 + $0x18] sm:$0xff] %v1114_v37  ;;  %v805_v62 = vadd.f32 %v789_v59, %v717_v31  ;;  %v793_v2 = vld [vmem:[%s1926_s21 + $0x48] sm:$0xff]  ;;  %v794_v3 = vld [vmem:[%s1926_s21 + $0x50] sm:$0xff]  ;;  %818 = vst [vmem:[%s1935_s2 + $0x10] sm:$0xff] %v802_v56  ;;  %v808_v4 = vadd.f32 %v792_v1, %v720_v36 }
 0x1b1   : > { %783 = vst [vmem:[%s1933_s8 + $0x38] sm:$0xff] %v1118_v50  ;;  %819 = vst [vmem:[%s1935_s2 + $0x18] sm:$0xff] %v803_v57  ;;  %v809_v5 = vadd.f32 %v793_v2, %v721_v38  ;;  %v810_v6 = vadd.f32 %v794_v3, %v722_v39  ;;  %v795_v7 = vld [vmem:[%s1926_s21 + $0x58] sm:$0xff]  ;;  %v796_v8 = vld [vmem:[%s1926_s21 + $0x60] sm:$0xff] }
 0x1b2   : > { %820 = vst [vmem:[%s1935_s2 + $0x20] sm:$0xff] %v804_v58  ;;  %v797_v9 = vld [vmem:[%s1926_s21 + $0x68] sm:$0xff]  ;;  %821 = vst [vmem:[%s1935_s2 + $0x28] sm:$0xff] %v805_v62  ;;  %v811_v10 = vadd.f32 %v795_v7, %v723_v40  ;;  %v812_v11 = vadd.f32 %v796_v8, %v724_v43  ;;  %v798_v13 = vld [vmem:[%s1926_s21 + $0x70] sm:$0xff] }
 0x1b3   : > { %822 = vst [vmem:[%s1935_s2 + $0x30] sm:$0xff] %v806_v63  ;;  %823 = vst [vmem:[%s1935_s2 + $0x38] sm:$0xff] %v807_v0  ;;  %v813_v12 = vadd.f32 %v797_v9, %v725_v44  ;;  %v799_v14 = vld [vmem:[%s1926_s21 + $0x78] sm:$0xff]  ;;  %v814_v15 = vadd.f32 %v798_v13, %v726_v45 }
 0x1b4   : > { %824 = vst [vmem:[%s1935_s2 + $0x40] sm:$0xff] %v808_v4  ;;  %825 = vst [vmem:[%s1935_s2 + $0x48] sm:$0xff] %v809_v5  ;;  %v815_v16 = vadd.f32 %v799_v14, %v727_v47 }
 0x1b5   : > { %826 = vst [vmem:[%s1935_s2 + $0x50] sm:$0xff] %v810_v6  ;;  %827 = vst [vmem:[%s1935_s2 + $0x58] sm:$0xff] %v811_v10 }
 0x1b6   : > { %828 = vst [vmem:[%s1935_s2 + $0x60] sm:$0xff] %v812_v11  ;;  %829 = vst [vmem:[%s1935_s2 + $0x68] sm:$0xff] %v813_v12 }
 0x1b7   : > { %830 = vst [vmem:[%s1935_s2 + $0x70] sm:$0xff] %v814_v15  ;;  %831 = vst [vmem:[%s1935_s2 + $0x78] sm:$0xff] %v815_v16 }
 0x1b8 PF: > { %s2191_s12 = sld [smem:[#allocation19_spill]]  ;;  %s851_s0 = sshll.u32 %s1933_s8, 4  ;;  %s2026_s0 = int_to_ptr.vmem [resolvable:$true] %s851_s0 }
 0x1b9   : > { %s2192_s30 = sld [smem:[#allocation27_spill]]  ;;  %s833_s7 = scalar_lea.sflag [#allocation5], %s1923_s4 }
 0x1ba   : > { %s1449_s9 = scalar_lea.vmem %s2026_s0, 1024  ;;  %s1642_s3 = smov [#allocation9]  }
 0x1bb   : > { %p1450_p5 = scmp.ne.s32.totalorder %s2026_s0, %s1449_s9  ;;  %s1453_s25 = sshll.u32 %s1642_s3, 4  ;;  %s1454_s25 = int_to_ptr.vmem [resolvable:$false] %s1453_s25 }
 0x1bc   : > { %s1455_s21 = scalar_lea.vmem %s1454_s25, 2048  ;;  %p1456_p13 = scmp.lt.s32.totalorder %s2026_s0, %s1454_s25 }
 0x1bd   : > { %p1451_p3 = pnand %p1450_p5, %p1880_p12  ;;  %p1457_p4 = scmp.lt.s32.totalorder %s1455_s21, %s1449_s9 }
 0x1be   : > { %s1119_s19 = sshll.u32 %s2191_s12, 7 }
 0x1bf   : > { %s2023_s10 = scalar_lea.hbm %s2192_s30, %s1119_s19  ;;  %p1452_p0 = pneg %p1451_p3 }
 0x1c0   : > { %p1458_p6 = por %p1457_p4, %p1456_p13 }
 0x1c2   : > { %p1459_p10 = pnand %p1458_p6, %p1452_p0 }
 0x1c4   : > { %1462 = shalt.err (!%p1459_p10)
}
 0x1c5   : > { %s1463_s29 = scalar_lea.hbm %s2023_s10, 1024  ;;  %s1467_s24 = scalar_lea.hbm %s2192_s30, 2048 }
 0x1c6   : > { %p1464_p7 = scmp.ne.s32.totalorder %s2023_s10, %s1463_s29  ;;  %p1468_p1 = scmp.lt.s32.totalorder %s2023_s10, %s2192_s30 }
 0x1c7   : > { %p1469_p8 = scmp.lt.s32.totalorder %s1467_s24, %s1463_s29 }
 0x1c8   : > { %p1465_p11 = pnand %p1464_p7, %p1880_p12 }
 0x1c9   : > { %p1470_p2 = por %p1469_p8, %p1468_p1 }
 0x1ca   : > { %p1466_p9 = pneg %p1465_p11 }
 0x1cc   : > { %p1471_p5 = pnand %p1470_p2, %p1466_p9 }
 0x1ce   : > { %1474 = shalt.err (!%p1471_p5)
}
 0x1cf   : > { %s1643_s1 = smov 128   ;;  %s1644_s9 = smov 256  }
 0x1d0   : > { %s1645_s3 = smov 8   ;;  %s1120_s25 = sshll.u32 %s2191_s12, 8 }
 0x1d1   : > { %1159 = dma.vmem_to_hbm [thread:$0]  (%p1880_p12), %s2026_s0, 1024, %s2023_s10, %s833_s7, %s1643_s1, %s1644_s9, %s1645_s3  }
 0x1d2   : > { %s2193_s8 = sld [smem:[#allocation28_spill]]  ;;  %s867_s24 = sshll.u32 %s1935_s2, 4  ;;  %s2059_s24 = int_to_ptr.vmem [resolvable:$true] %s867_s24 }
 0x1d3   : > { %s838_s19 = scalar_lea.sflag [#allocation11], %s1923_s4  ;;  %s1475_s27 = scalar_lea.vmem %s2059_s24, 2048 }
 0x1d4   : > { %p1476_p3 = scmp.ne.s32.totalorder %s2059_s24, %s1475_s27  ;;  %s1646_s30 = smov [#allocation10]  }
 0x1d5   : > { %s1479_s10 = sshll.u32 %s1646_s30, 4  ;;  %s1480_s10 = int_to_ptr.vmem [resolvable:$false] %s1479_s10 }
 0x1d6   : > { %p1477_p0 = pnand %p1476_p3, %p1880_p12  ;;  %s1481_s12 = scalar_lea.vmem %s1480_s10, 4096 }
 0x1d7   : > { %p1482_p4 = scmp.lt.s32.totalorder %s2059_s24, %s1480_s10  ;;  %p1483_p6 = scmp.lt.s32.totalorder %s1481_s12, %s1475_s27 }
 0x1d8   : > { %s2056_s14 = scalar_lea.hbm %s2193_s8, %s1120_s25  ;;  %p1478_p13 = pneg %p1477_p0 }
 0x1d9   : > { %p1484_p10 = por %p1483_p6, %p1482_p4 }
 0x1db   : > { %p1485_p7 = pnand %p1484_p10, %p1478_p13 }
 0x1dd   : > { %1488 = shalt.err (!%p1485_p7)
}
 0x1de   : > { %s1489_s2 = scalar_lea.hbm %s2056_s14, 2048  ;;  %s1493_s30 = scalar_lea.hbm %s2193_s8, 4096 }
 0x1df   : > { %p1490_p11 = scmp.ne.s32.totalorder %s2056_s14, %s1489_s2  ;;  %p1494_p8 = scmp.lt.s32.totalorder %s2056_s14, %s2193_s8 }
 0x1e0   : > { %p1495_p2 = scmp.lt.s32.totalorder %s1493_s30, %s1489_s2 }
 0x1e1   : > { %p1491_p9 = pnand %p1490_p11, %p1880_p12 }
 0x1e2   : > { %p1496_p5 = por %p1495_p2, %p1494_p8 }
 0x1e3   : > { %p1492_p1 = pneg %p1491_p9 }
 0x1e5   : > { %p1497_p3 = pnand %p1496_p5, %p1492_p1 }
 0x1e7   : > { %1500 = shalt.err (!%p1497_p3)
}
 0x1e8   : > { %s1647_s25 = smov 512   ;;  %s1648_s21 = smov 16  }
 0x1e9   : > { %1160 = dma.vmem_to_hbm [thread:$0]  (%p1880_p12), %s2059_s24, 2048, %s2056_s14, %s838_s19, %s1644_s9, %s1647_s25, %s1648_s21  }
 0x1ea PF: > { %p1181_p0 = scmp.ge.s32.totalorder %s1631_s28, 2  ;;  %s882_s29 = sand.u32 1, %s1579_s15  }
 0x1eb   : > { %p2194_p13 = scmp.ne.s32.totalorder %s2183_s5, 0  ;;  %s883_s27 = scalar_lea.sflag [#allocation5], %s882_s29 }
 0x1ed   : > { %p1174_p4 = pnand %p1181_p0, %p2194_p13 }
 0x1ef   : > { %p1175_p6 = pneg %p1174_p4 }
 0x1f1   : > { %1570 = dma.done.wait (%p1175_p6), %s883_s27, 1024  }
 0x1f2   : > { %1572 = vsyncadd (%p1175_p6), %s883_s27, 4294966272  ;;  %s892_s10 = scalar_lea.sflag [#allocation11], %s882_s29 }
 0x1f3   : > { %1574 = dma.done.wait (%p1175_p6), %s892_s10, 2048  }
 0x1f4   : > { %1576 = vsyncadd (%p1175_p6), %s892_s10, 4294965248  ;;  %s27_s28 = sadd.s32 1, %s1631_s28   ;;  %s2196_s4 = sld [smem:[#allocation17_spill]] }
 0x1f5   : > { %p2090_p10 = scmp.ge.s32.totalorder %s27_s28, 6   ;;  %s2197_s5 = smov %s1829_s18 }
 0x1f6   : > { %s2198_s25 = sld [smem:[#allocation20_spill]]  ;;  %s2201_s15 = smov %s1583_s16 }
 0x1f7   : > { %s2199_s9 = sld [smem:[#allocation21_spill]]  ;;  %s2202_s16 = smov %s1587_s17 }
 0x1f8   : > { %s2200_s27 = sld [smem:[#allocation22_spill]]  ;;  %s2203_s17 = smov %s1865_s6 }
 0x1f9   : > { %s2205_s19 = smov %s1599_s20  ;;  %s2206_s20 = smov %s1785_s13 }
 0x1fa   : > { %s2204_s18 = smov %s2196_s4  ;;  %s2207_s21 = smov %s1607_s22 }
 0x1fb   : > { %s2208_s22 = smov %s1611_s23  ;;  %s2209_s23 = smov %s2197_s5 }
 0x1fc   : > { %s2210_s24 = smov %s1623_s26  ;;  %26 = sbr.rel (!%p2090_p10) target bundleno = 20 (0x14), region = 126 }
 0x1fd   : > { %s2211_s26 = smov %s2199_s9 }
 0x201   :  { %897 = vsyncpa [#allocation4], 1 }
 0x202   :  { %899 = vsyncpa [#allocation4 + $0x1], 1 }
 0x203   :  { %900 = vsyncpa [#allocation7], 1 }
 0x204   :  { %902 = vsyncpa [#allocation7 + $0x1], 1 }
 0x205   :  { %903 = vsyncpa [#allocation5], 1 }
 0x206   :  { %905 = vsyncpa [#allocation5 + $0x1], 1 }
 0x207   :  { %906 = vsyncpa [#allocation11], 1 }
 0x208   :  { %908 = vsyncpa [#allocation11 + $0x1], 1 }

</bundles_post_ra>
